<compile_context>
chip_gen: v7x
topology: tpu7x:2x2x1
jax: 0.10.0
libtpu: 0.0.40
codegen_flags: <defaults>
</compile_context>

<pallas_src>
import functools

import jax
import jax.numpy as jnp
from jax.experimental import pallas as pl
from jax.experimental.pallas import tpu as pltpu


def _round_up(x, m):
    return ((x + m - 1) // m) * m


# ----------------------------------------------------------------------------
# Kernel 1: mean-pool over seq + Linear(H,1) (VPU formulation) + per-row BCE.
# Gridded over the N (row) axis so [N,S,H] streams through VMEM double-buffered.
# Row blocks may overhang N; overhanging output rows are dropped on write.
# ----------------------------------------------------------------------------
def _clf_head_kernel(hid_ref, w_ref, b_ref, y_ref, logits_ref, bce_ref):
    h = hid_ref[...].astype(jnp.float32)            # [TN, S, H]
    s = h.shape[1]
    # torch.mean(..., dim=1) with the 1/S folded into the [TN,1] result below
    # (saves a [TN,H] VPU multiply per tile).
    pooled_sum = jnp.sum(h, axis=1)                 # [TN, H]
    # TODO(synk): nn.Dropout(0.1) is stochastic in train mode; identity (eval).
    w = w_ref[...].astype(jnp.float32)              # [1, H]
    b = b_ref[...].astype(jnp.float32)              # [1, 1]
    # Linear(H -> 1) as broadcast-multiply + lane reduction (VPU/XLU); an
    # [N,H]x[H,1] MXU matmul would light up a single output column only.
    x = jnp.sum(pooled_sum * w, axis=-1, keepdims=True) * (1.0 / s) + b  # [TN,1]
    logits_ref[...] = x
    y = y_ref[...].astype(jnp.float32)              # [TN, 1]
    # Numerically stable BCE-with-logits per row (mean taken by the caller).
    bce_ref[...] = jnp.maximum(x, 0.0) - x * y + jnp.log1p(jnp.exp(-jnp.abs(x)))


def clf_head(hidden_states, w_row, b, clf_labels_col, *, row_tile=16):
    """hidden_states: [N,S,H] (bf16 or f32), w_row: [1,H] f32, b: [1,1] f32,
    clf_labels_col: [N,1] f32.  Returns ([N,1] logits f32, scalar BCE mean)."""
    n, s, h = hidden_states.shape
    # Row block: multiple of 8 (sublane rule for the (tn,1) label/output blocks),
    # clamped so tiny inputs do not force an oversized block.  N need NOT be
    # divisible by the tile: the last block overhangs and OOB rows are masked
    # out of the output writes.
    tn = min(_round_up(max(row_tile, 8), 8), _round_up(n, 8))
    grid = (pl.cdiv(n, tn),)
    bytes_in = n * s * h * hidden_states.dtype.itemsize
    logits, bce = pl.pallas_call(
        _clf_head_kernel,
        grid=grid,
        in_specs=[
            pl.BlockSpec((tn, s, h), lambda i: (i, 0, 0)),
            pl.BlockSpec((1, h), lambda i: (0, 0)),
            pl.BlockSpec((1, 1), lambda i: (0, 0)),
            pl.BlockSpec((tn, 1), lambda i: (i, 0)),
        ],
        out_specs=(
            pl.BlockSpec((tn, 1), lambda i: (i, 0)),
            pl.BlockSpec((tn, 1), lambda i: (i, 0)),
        ),
        out_shape=(
            jax.ShapeDtypeStruct((n, 1), jnp.float32),   # clf_predict_logits
            jax.ShapeDtypeStruct((n, 1), jnp.float32),   # per-row BCE terms
        ),
        cost_estimate=pl.CostEstimate(
            flops=3 * n * s * h,
            transcendentals=2 * n,
            bytes_accessed=bytes_in + (h + 3 * n + 2) * 4,
        ),
        compiler_params=pltpu.CompilerParams(
            dimension_semantics=("parallel",),
            vmem_limit_bytes=48 * 1024 * 1024,
        ),
    )(hidden_states, w_row, b, clf_labels_col)
    return logits, jnp.mean(bce)


# ----------------------------------------------------------------------------
# Kernel 2: token-level cross-entropy with ignore_index=-100, tiled over
# (rows, vocab) with an online-softmax accumulator (flash-style).  Rows are
# "parallel" (shards across TensorCores on v7x); vocab is the innermost
# "arbitrary" reduction axis so the accumulator stays resident in VMEM scratch.
# Neither N nor V needs to divide the tile sizes: overhanging output rows are
# dropped on write and overhanging vocab columns are masked to -inf.
# ----------------------------------------------------------------------------
def _gen_ce_kernel(lbl_ref, z_ref, nll_ref, cnt_ref, m_sc, l_sc, t_sc,
                   *, tile_v, vocab):
    k = pl.program_id(1)

    @pl.when(k == 0)
    def _():
        m_sc[...] = jnp.full(m_sc.shape, -jnp.inf, m_sc.dtype)
        l_sc[...] = jnp.zeros(l_sc.shape, l_sc.dtype)
        t_sc[...] = jnp.zeros(t_sc.shape, t_sc.dtype)

    z = z_ref[...].astype(jnp.float32)              # [TN, TV] (f32 accumulation)
    lbl = lbl_ref[...]                              # [TN, 1] int32

    col = jax.lax.broadcasted_iota(jnp.int32, z.shape, 1)   # LOCAL column index
    if vocab % tile_v != 0:
        # Last vocab tile overhangs V: mask the padding columns to -inf so they
        # contribute nothing to the running max / sum-exp.  `limit` is a scalar
        # (no full-tile offset add); exactly-divisible V skips this entirely.
        limit = vocab - k * tile_v
        z = jnp.where(col < limit, z, -jnp.inf)

    # Online log-sum-exp update.
    m_prev = m_sc[...]
    m_new = jnp.maximum(m_prev, jnp.max(z, axis=-1, keepdims=True))
    l_sc[...] = jnp.exp(m_prev - m_new) * l_sc[...] + jnp.sum(
        jnp.exp(z - m_new), axis=-1, keepdims=True)
    m_sc[...] = m_new

    # True-logit extraction: local iota vs (lbl - k*tile_v) broadcast from
    # [TN,1]; no float one-hot, no full-tile iota offset add.  Ignored labels
    # (-100) and padding columns never match.
    t_sc[...] += jnp.sum(
        jnp.where(col == (lbl - k * tile_v), z, 0.0), axis=-1, keepdims=True)

    @pl.when(k == pl.num_programs(1) - 1)
    def _():
        lse = m_sc[...] + jnp.log(l_sc[...])
        mask = (lbl != -100).astype(jnp.float32)
        nll_ref[...] = (lse - t_sc[...]) * mask     # masked per-row NLL
        cnt_ref[...] = mask                         # per-row valid-token count


def gen_cross_entropy(lm_logits_2d, gen_labels_2d, *, row_tile=256,
                      vocab_tile=2048):
    """lm_logits_2d: [N,V] (bf16 or f32), gen_labels_2d: [N,1] int32 (may be -100)."""
    n, v = lm_logits_2d.shape
    # ~1 MiB bf16 per logits block at the defaults (256 x 2048); clamped to the
    # (8/128-rounded) array extents so small inputs keep small blocks.
    tn = min(_round_up(max(row_tile, 8), 8), _round_up(n, 8))
    tv = min(_round_up(max(vocab_tile, 128), 128), _round_up(v, 128))
    grid = (pl.cdiv(n, tn), pl.cdiv(v, tv))
    kernel = functools.partial(_gen_ce_kernel, tile_v=tv, vocab=v)
    bytes_in = n * v * lm_logits_2d.dtype.itemsize
    nll, cnt = pl.pallas_call(
        kernel,
        grid=grid,
        in_specs=[
            # Label block index is constant along the vocab axis -> the (tn,1)
            # block is fetched once per row block, not once per vocab step.
            pl.BlockSpec((tn, 1), lambda r, k: (r, 0)),
            pl.BlockSpec((tn, tv), lambda r, k: (r, k)),
        ],
        out_specs=(
            pl.BlockSpec((tn, 1), lambda r, k: (r, 0)),
            pl.BlockSpec((tn, 1), lambda r, k: (r, 0)),
        ),
        out_shape=(
            jax.ShapeDtypeStruct((n, 1), jnp.float32),
            jax.ShapeDtypeStruct((n, 1), jnp.float32),
        ),
        scratch_shapes=[
            pltpu.VMEM((tn, 1), jnp.float32),   # running max
            pltpu.VMEM((tn, 1), jnp.float32),   # running sum-exp
            pltpu.VMEM((tn, 1), jnp.float32),   # accumulated true logit
        ],
        cost_estimate=pl.CostEstimate(
            flops=6 * n * v,
            transcendentals=n * v,
            bytes_accessed=bytes_in + 3 * n * 4,
        ),
        compiler_params=pltpu.CompilerParams(
            dimension_semantics=("parallel", "arbitrary"),
            vmem_limit_bytes=48 * 1024 * 1024,
        ),
    )(gen_labels_2d, lm_logits_2d)
    # NOTE: PyTorch returns NaN when every label is -100; we return 0 instead
    # (denominator clamped to 1) -- intentional divergence.
    denom = jnp.maximum(jnp.sum(cnt), 1.0)
    return jnp.sum(nll) / denom


# ----------------------------------------------------------------------------
# Wrapper reproducing the module's forward-pass arithmetic.
# ----------------------------------------------------------------------------
@functools.partial(jax.jit, static_argnames=("sample_size", "clf_row_tile",
                                             "ce_row_tile", "ce_vocab_tile"))
def t5_multitask_forward(clf_hidden_states, cls_w_row, cls_b, clf_labels,
                         lm_logits, gen_labels, sample_size,
                         clf_row_tile=16, ce_row_tile=256, ce_vocab_tile=2048):
    # TODO(synk): the pretrained T5 encoder/decoder, the tokenizer string
    # concatenation and the candidate filtering have no Pallas equivalent;
    # their numeric outputs (clf_hidden_states, lm_logits) are inputs here.
    n = clf_hidden_states.shape[0]
    clf_logits, clf_loss = clf_head(
        clf_hidden_states, cls_w_row, cls_b,
        clf_labels.reshape(n, 1).astype(jnp.float32),
        row_tile=clf_row_tile)
    b, t, v = lm_logits.shape
    gen_loss = gen_cross_entropy(lm_logits.reshape(b * t, v),
                                 gen_labels.reshape(b * t, 1),
                                 row_tile=ce_row_tile, vocab_tile=ce_vocab_tile)
    total_loss = gen_loss + clf_loss
    # clf logits reshaped to (gen_batch, sample_size), as in the module (used
    # downstream only for python-side candidate filtering).
    clf_logits_reshaped = clf_logits.reshape(n // sample_size, sample_size)
    return total_loss, clf_logits_reshaped, clf_loss, gen_loss


if __name__ == "__main__":
    key = jax.random.PRNGKey(0)
    k1, k2, k3, k4, k5, k6 = jax.random.split(key, 6)

    # Small, module-consistent shapes chosen so both grids have multiple blocks
    # AND exercise the non-divisible row / vocab masking paths.
    H = 64            # hidden_size of the (synthetic) T5 encoder
    S_clf = 16        # clf sequence length
    sample_size = 5   # candidates per generation example
    B_gen = 3         # generation batch size
    N_clf = B_gen * sample_size   # clf batch size = 15 (not a multiple of 8)
    T_gen = 9         # target sequence length -> N_gen = 27 (not mult of 8)
    V = 320           # vocab size (not a multiple of the 128 demo vocab tile)

    # Synthetic encoder last_hidden_state for the clf branch (bf16 in HBM).
    clf_hidden_states = jax.random.normal(
        k1, (N_clf, S_clf, H), jnp.float32).astype(jnp.bfloat16)
    # Deterministic nn.Linear(hidden_size, 1) init (uniform +-1/sqrt(H)).
    bound = 1.0 / (H ** 0.5)
    cls_w = jax.random.uniform(k2, (H, 1), jnp.float32, -bound, bound)
    cls_b = jax.random.uniform(k3, (1, 1), jnp.float32, -bound, bound)
    # Binary clf labels.
    clf_labels = jax.random.bernoulli(k4, 0.5, (N_clf,)).astype(jnp.float32)
    # Synthetic LM-head logits (bf16) and generation labels with ignored tokens.
    lm_logits = (2.0 * jax.random.normal(
        k5, (B_gen, T_gen, V), jnp.float32)).astype(jnp.bfloat16)
    gen_labels = jax.random.randint(k6, (B_gen, T_gen), 0, V, jnp.int32)
    gen_labels = gen_labels.at[:, -2:].set(-100)   # padding positions

    # Small demo tiles to force multi-block grids + masked last tiles.
    total_loss, clf_logits, clf_loss, gen_loss = jax.block_until_ready(
        t5_multitask_forward(clf_hidden_states, cls_w.reshape(1, H), cls_b,
                             clf_labels, lm_logits, gen_labels, sample_size,
                             clf_row_tile=8, ce_row_tile=8, ce_vocab_tile=128)
    )

    # Pure-JAX reference check on the same (bf16-rounded) inputs.
    hid32 = clf_hidden_states.astype(jnp.float32)
    pooled_ref = jnp.mean(hid32, axis=1)
    logits_ref = pooled_ref @ cls_w + cls_b
    y = clf_labels.reshape(-1, 1)
    clf_loss_ref = jnp.mean(jnp.maximum(logits_ref, 0.0) - logits_ref * y
                            + jnp.log1p(jnp.exp(-jnp.abs(logits_ref))))
    z = lm_logits.astype(jnp.float32).reshape(-1, V)
    lbl = gen_labels.reshape(-1)
    logp = jax.nn.log_softmax(z, axis=-1)
    nll = -jnp.take_along_axis(logp, jnp.clip(lbl, 0)[:, None], axis=-1)[:, 0]
    mask = (lbl != -100).astype(jnp.float32)
    gen_loss_ref = jnp.sum(nll * mask) / jnp.sum(mask)
    total_ref = gen_loss_ref + clf_loss_ref

    assert jnp.allclose(clf_logits.reshape(-1, 1), logits_ref, atol=1e-4, rtol=1e-4)
    assert jnp.allclose(clf_loss, clf_loss_ref, atol=1e-4, rtol=1e-4)
    assert jnp.allclose(gen_loss, gen_loss_ref, atol=1e-4, rtol=1e-4)
    assert jnp.allclose(total_loss, total_ref, atol=1e-4, rtol=1e-4)

    print("KERNEL_OK")
</pallas_src>

<mosaic_0001>
module attributes {stable_mosaic.version = 11 : i64} {
  func.func @_gen_ce_kernel(%arg0: i32, %arg1: i32, %arg2: memref<8x1xi32, #tpu.memory_space<vmem>>, %arg3: memref<8x128xbf16, #tpu.memory_space<vmem>>, %arg4: memref<8x1xf32, #tpu.memory_space<vmem>>, %arg5: memref<8x1xf32, #tpu.memory_space<vmem>>, %arg6: memref<8x1xf32, #tpu.memory_space<vmem>>, %arg7: memref<8x1xf32, #tpu.memory_space<vmem>>, %arg8: memref<8x1xf32, #tpu.memory_space<vmem>>) attributes {dimension_semantics = [#tpu.dimension_semantics<parallel>, #tpu.dimension_semantics<arbitrary>], iteration_bounds = array<i64: 4, 3>, scalar_prefetch = 0 : i64, scratch_operands = 3 : i64, tpu.core_type = #tpu.core_type<tc>, window_params = [{transform_indices = @transform_0, window_bounds = array<i64: 8, 1>}, {transform_indices = @transform_1, window_bounds = array<i64: 8, 128>}, {transform_indices = @transform_2, window_bounds = array<i64: 8, 1>}, {transform_indices = @transform_3, window_bounds = array<i64: 8, 1>}]} {
    %c0_i32 = arith.constant 0 : i32
    %0 = arith.cmpi eq, %arg1, %c0_i32 : i32
    %1 = arith.extui %0 : i1 to i32
    %c0_i32_0 = arith.constant 0 : i32
    %2 = arith.cmpi ne, %1, %c0_i32_0 : i32
    scf.if %2 {
      %cst_22 = arith.constant 0xFF800000 : f32
      %44 = vector.broadcast %cst_22 : f32 to vector<8x1xf32>
      %c0_23 = arith.constant 0 : index
      %c0_24 = arith.constant 0 : index
      %45 = vector.load %arg6[%c0_23, %c0_24] : memref<8x1xf32, #tpu.memory_space<vmem>>, vector<8x1xf32>
      tpu.vector_store %arg6[%c0_23, %c0_24], %44 {strides = array<i32>} : memref<8x1xf32, #tpu.memory_space<vmem>>, vector<8x1xf32>,
      %cst_25 = arith.constant 0.000000e+00 : f32
      %46 = vector.broadcast %cst_25 : f32 to vector<8x1xf32>
      %c0_26 = arith.constant 0 : index
      %c0_27 = arith.constant 0 : index
      %47 = vector.load %arg7[%c0_26, %c0_27] : memref<8x1xf32, #tpu.memory_space<vmem>>, vector<8x1xf32>
      tpu.vector_store %arg7[%c0_26, %c0_27], %46 {strides = array<i32>} : memref<8x1xf32, #tpu.memory_space<vmem>>, vector<8x1xf32>,
      %cst_28 = arith.constant 0.000000e+00 : f32
      %48 = vector.broadcast %cst_28 : f32 to vector<8x1xf32>
      %c0_29 = arith.constant 0 : index
      %c0_30 = arith.constant 0 : index
      %49 = vector.load %arg8[%c0_29, %c0_30] : memref<8x1xf32, #tpu.memory_space<vmem>>, vector<8x1xf32>
      tpu.vector_store %arg8[%c0_29, %c0_30], %48 {strides = array<i32>} : memref<8x1xf32, #tpu.memory_space<vmem>>, vector<8x1xf32>,
    } else {
    }
    %c0 = arith.constant 0 : index
    %c0_1 = arith.constant 0 : index
    %3 = vector.load %arg3[%c0, %c0_1] : memref<8x128xbf16, #tpu.memory_space<vmem>>, vector<8x128xbf16>
    %4 = arith.extf %3 : vector<8x128xbf16> to vector<8x128xf32>
    %c0_2 = arith.constant 0 : index
    %c0_3 = arith.constant 0 : index
    %5 = vector.load %arg2[%c0_2, %c0_3] : memref<8x1xi32, #tpu.memory_space<vmem>>, vector<8x1xi32>
    %6 = tpu.iota {dimensions = array<i32: 1>} : vector<8x128xi32>
    %c128_i32 = arith.constant 128 : i32
    %7 = arith.muli %arg1, %c128_i32 : i32
    %c320_i32 = arith.constant 320 : i32
    %8 = arith.subi %c320_i32, %7 : i32
    %9 = vector.broadcast %8 : i32 to vector<8x128xi32>
    %10 = arith.cmpi slt, %6, %9 : vector<8x128xi32>
    %cst = arith.constant 0xFF800000 : f32
    %11 = vector.broadcast %cst : f32 to vector<8x128xf32>
    %12 = arith.select %10, %4, %11 : vector<8x128xi1>, vector<8x128xf32>
    %c0_4 = arith.constant 0 : index
    %c0_5 = arith.constant 0 : index
    %13 = vector.load %arg6[%c0_4, %c0_5] : memref<8x1xf32, #tpu.memory_space<vmem>>, vector<8x1xf32>
    %cst_6 = arith.constant dense<0xFF800000> : vector<8xf32>
    %14 = vector.multi_reduction <maximumf>, %12, %cst_6 [1] : vector<8x128xf32> to vector<8xf32>
    %15 = vector.shape_cast %14 : vector<8xf32> to vector<8x1xf32>
    %16 = arith.maximumf %13, %15 : vector<8x1xf32>
    %17 = arith.subf %13, %16 : vector<8x1xf32>
    %18 = math.exp %17 : vector<8x1xf32>
    %c0_7 = arith.constant 0 : index
    %c0_8 = arith.constant 0 : index
    %19 = vector.load %arg7[%c0_7, %c0_8] : memref<8x1xf32, #tpu.memory_space<vmem>>, vector<8x1xf32>
    %20 = arith.mulf %18, %19 : vector<8x1xf32>
    %21 = vector.broadcast %16 : vector<8x1xf32> to vector<8x128xf32>
    %22 = arith.subf %12, %21 : vector<8x128xf32>
    %23 = math.exp %22 : vector<8x128xf32>
    %cst_9 = arith.constant dense<0.000000e+00> : vector<8xf32>
    %24 = vector.multi_reduction <add>, %23, %cst_9 [1] : vector<8x128xf32> to vector<8xf32>
    %25 = vector.shape_cast %24 : vector<8xf32> to vector<8x1xf32>
    %26 = arith.addf %20, %25 : vector<8x1xf32>
    %c0_10 = arith.constant 0 : index
    %c0_11 = arith.constant 0 : index
    %27 = vector.load %arg7[%c0_10, %c0_11] : memref<8x1xf32, #tpu.memory_space<vmem>>, vector<8x1xf32>
    tpu.vector_store %arg7[%c0_10, %c0_11], %26 {strides = array<i32>} : memref<8x1xf32, #tpu.memory_space<vmem>>, vector<8x1xf32>,
    %c0_12 = arith.constant 0 : index
    %c0_13 = arith.constant 0 : index
    %28 = vector.load %arg6[%c0_12, %c0_13] : memref<8x1xf32, #tpu.memory_space<vmem>>, vector<8x1xf32>
    tpu.vector_store %arg6[%c0_12, %c0_13], %16 {strides = array<i32>} : memref<8x1xf32, #tpu.memory_space<vmem>>, vector<8x1xf32>,
    %c0_14 = arith.constant 0 : index
    %c0_15 = arith.constant 0 : index
    %29 = vector.load %arg8[%c0_14, %c0_15] : memref<8x1xf32, #tpu.memory_space<vmem>>, vector<8x1xf32>
    %c128_i32_16 = arith.constant 128 : i32
    %30 = arith.muli %arg1, %c128_i32_16 : i32
    %31 = vector.broadcast %30 : i32 to vector<8x1xi32>
    %32 = arith.subi %5, %31 : vector<8x1xi32>
    %33 = vector.broadcast %32 : vector<8x1xi32> to vector<8x128xi32>
    %34 = arith.cmpi eq, %6, %33 : vector<8x128xi32>
    %cst_17 = arith.constant 0.000000e+00 : f32
    %35 = vector.broadcast %cst_17 : f32 to vector<8x128xf32>
    %36 = arith.select %34, %12, %35 : vector<8x128xi1>, vector<8x128xf32>
    %cst_18 = arith.constant dense<0.000000e+00> : vector<8xf32>
    %37 = vector.multi_reduction <add>, %36, %cst_18 [1] : vector<8x128xf32> to vector<8xf32>
    %38 = vector.shape_cast %37 : vector<8xf32> to vector<8x1xf32>
    %39 = arith.addf %29, %38 : vector<8x1xf32>
    %c0_19 = arith.constant 0 : index
    %c0_20 = arith.constant 0 : index
    %40 = vector.load %arg8[%c0_19, %c0_20] : memref<8x1xf32, #tpu.memory_space<vmem>>, vector<8x1xf32>
    tpu.vector_store %arg8[%c0_19, %c0_20], %39 {strides = array<i32>} : memref<8x1xf32, #tpu.memory_space<vmem>>, vector<8x1xf32>,
    %c2_i32 = arith.constant 2 : i32
    %41 = arith.cmpi eq, %arg1, %c2_i32 : i32
    %42 = arith.extui %41 : i1 to i32
    %c0_i32_21 = arith.constant 0 : i32
    %43 = arith.cmpi ne, %42, %c0_i32_21 : i32
    scf.if %43 {
      %c0_22 = arith.constant 0 : index
      %c0_23 = arith.constant 0 : index
      %44 = vector.load %arg6[%c0_22, %c0_23] : memref<8x1xf32, #tpu.memory_space<vmem>>, vector<8x1xf32>
      %c0_24 = arith.constant 0 : index
      %c0_25 = arith.constant 0 : index
      %45 = vector.load %arg7[%c0_24, %c0_25] : memref<8x1xf32, #tpu.memory_space<vmem>>, vector<8x1xf32>
      %46 = math.log %45 : vector<8x1xf32>
      %47 = arith.addf %44, %46 : vector<8x1xf32>
      %c-100_i32 = arith.constant -100 : i32
      %48 = vector.broadcast %c-100_i32 : i32 to vector<8x1xi32>
      %49 = arith.cmpi ne, %5, %48 : vector<8x1xi32>
      %50 = arith.extui %49 : vector<8x1xi1> to vector<8x1xi32>
      %51 = arith.sitofp %50 : vector<8x1xi32> to vector<8x1xf32>
      %c0_26 = arith.constant 0 : index
      %c0_27 = arith.constant 0 : index
      %52 = vector.load %arg8[%c0_26, %c0_27] : memref<8x1xf32, #tpu.memory_space<vmem>>, vector<8x1xf32>
      %53 = arith.subf %47, %52 : vector<8x1xf32>
      %54 = arith.mulf %53, %51 : vector<8x1xf32>
      %c0_28 = arith.constant 0 : index
      %c0_29 = arith.constant 0 : index
      %55 = vector.load %arg4[%c0_28, %c0_29] : memref<8x1xf32, #tpu.memory_space<vmem>>, vector<8x1xf32>
      tpu.vector_store %arg4[%c0_28, %c0_29], %54 {strides = array<i32>} : memref<8x1xf32, #tpu.memory_space<vmem>>, vector<8x1xf32>,
      %c0_30 = arith.constant 0 : index
      %c0_31 = arith.constant 0 : index
      %56 = vector.load %arg5[%c0_30, %c0_31] : memref<8x1xf32, #tpu.memory_space<vmem>>, vector<8x1xf32>
      tpu.vector_store %arg5[%c0_30, %c0_31], %51 {strides = array<i32>} : memref<8x1xf32, #tpu.memory_space<vmem>>, vector<8x1xf32>,
    } else {
    }
    return
  }
  func.func @transform_0(%arg0: i32, %arg1: i32) -> (i32, i32) {
    %c0_i32 = arith.constant 0 : i32
    %c0_i32_0 = arith.constant 0 : i32
    return %arg0, %c0_i32 : i32, i32
  }
  func.func @transform_1(%arg0: i32, %arg1: i32) -> (i32, i32) {
    %c0_i32 = arith.constant 0 : i32
    return %arg0, %arg1 : i32, i32
  }
  func.func @transform_2(%arg0: i32, %arg1: i32) -> (i32, i32) {
    %c0_i32 = arith.constant 0 : i32
    %c0_i32_0 = arith.constant 0 : i32
    return %arg0, %c0_i32 : i32, i32
  }
  func.func @transform_3(%arg0: i32, %arg1: i32) -> (i32, i32) {
    %c0_i32 = arith.constant 0 : i32
    %c0_i32_0 = arith.constant 0 : i32
    return %arg0, %c0_i32 : i32, i32
  }
}

module attributes {stable_mosaic.version = 11 : i64} {
  func.func @_clf_head_kernel(%arg0: i32, %arg1: memref<8x16x64xbf16, #tpu.memory_space<vmem>>, %arg2: memref<1x64xf32, #tpu.memory_space<vmem>>, %arg3: memref<1x1xf32, #tpu.memory_space<vmem>>, %arg4: memref<8x1xf32, #tpu.memory_space<vmem>>, %arg5: memref<8x1xf32, #tpu.memory_space<vmem>>, %arg6: memref<8x1xf32, #tpu.memory_space<vmem>>) attributes {dimension_semantics = [#tpu.dimension_semantics<parallel>], iteration_bounds = array<i64: 2>, scalar_prefetch = 0 : i64, scratch_operands = 0 : i64, tpu.core_type = #tpu.core_type<tc>, window_params = [{transform_indices = @transform_0, window_bounds = array<i64: 8, 16, 64>}, {pipeline_mode = #tpu.pipeline_mode<synchronous>, transform_indices = @transform_1, window_bounds = array<i64: 1, 64>}, {pipeline_mode = #tpu.pipeline_mode<synchronous>, transform_indices = @transform_2, window_bounds = array<i64: 1, 1>}, {transform_indices = @transform_3, window_bounds = array<i64: 8, 1>}, {transform_indices = @transform_4, window_bounds = array<i64: 8, 1>}, {transform_indices = @transform_5, window_bounds = array<i64: 8, 1>}]} {
    %c0 = arith.constant 0 : index
    %c0_0 = arith.constant 0 : index
    %c0_1 = arith.constant 0 : index
    %0 = vector.load %arg1[%c0, %c0_0, %c0_1] : memref<8x16x64xbf16, #tpu.memory_space<vmem>>, vector<8x16x64xbf16>
    %1 = arith.extf %0 : vector<8x16x64xbf16> to vector<8x16x64xf32>
    %cst = arith.constant dense<0.000000e+00> : vector<8x64xf32>
    %2 = vector.multi_reduction <add>, %1, %cst [1] : vector<8x16x64xf32> to vector<8x64xf32>
    %c0_2 = arith.constant 0 : index
    %c0_3 = arith.constant 0 : index
    %3 = vector.load %arg2[%c0_2, %c0_3] : memref<1x64xf32, #tpu.memory_space<vmem>>, vector<1x64xf32>
    %c0_4 = arith.constant 0 : index
    %c0_5 = arith.constant 0 : index
    %4 = vector.load %arg3[%c0_4, %c0_5] : memref<1x1xf32, #tpu.memory_space<vmem>>, vector<1x1xf32>
    %5 = vector.broadcast %3 : vector<1x64xf32> to vector<8x64xf32>
    %6 = arith.mulf %2, %5 : vector<8x64xf32>
    %cst_6 = arith.constant dense<0.000000e+00> : vector<8xf32>
    %7 = vector.multi_reduction <add>, %6, %cst_6 [1] : vector<8x64xf32> to vector<8xf32>
    %8 = vector.shape_cast %7 : vector<8xf32> to vector<8x1xf32>
    %cst_7 = arith.constant 6.250000e-02 : f32
    %9 = vector.broadcast %cst_7 : f32 to vector<8x1xf32>
    %10 = arith.mulf %8, %9 : vector<8x1xf32>
    %11 = vector.broadcast %4 : vector<1x1xf32> to vector<8x1xf32>
    %12 = arith.addf %10, %11 : vector<8x1xf32>
    %c0_8 = arith.constant 0 : index
    %c0_9 = arith.constant 0 : index
    %13 = vector.load %arg5[%c0_8, %c0_9] : memref<8x1xf32, #tpu.memory_space<vmem>>, vector<8x1xf32>
    tpu.vector_store %arg5[%c0_8, %c0_9], %12 {strides = array<i32>} : memref<8x1xf32, #tpu.memory_space<vmem>>, vector<8x1xf32>,
    %c0_10 = arith.constant 0 : index
    %c0_11 = arith.constant 0 : index
    %14 = vector.load %arg4[%c0_10, %c0_11] : memref<8x1xf32, #tpu.memory_space<vmem>>, vector<8x1xf32>
    %cst_12 = arith.constant 0.000000e+00 : f32
    %15 = vector.broadcast %cst_12 : f32 to vector<8x1xf32>
    %16 = arith.maximumf %12, %15 : vector<8x1xf32>
    %17 = arith.mulf %12, %14 : vector<8x1xf32>
    %18 = arith.subf %16, %17 : vector<8x1xf32>
    %19 = math.absf %12 : vector<8x1xf32>
    %cst_13 = arith.constant 0.000000e+00 : f32
    %20 = vector.broadcast %cst_13 : f32 to vector<8x1xf32>
    %21 = arith.subf %20, %19 : vector<8x1xf32>
    %22 = math.exp %21 : vector<8x1xf32>
    %23 = math.log1p %22 : vector<8x1xf32>
    %24 = arith.addf %18, %23 : vector<8x1xf32>
    %c0_14 = arith.constant 0 : index
    %c0_15 = arith.constant 0 : index
    %25 = vector.load %arg6[%c0_14, %c0_15] : memref<8x1xf32, #tpu.memory_space<vmem>>, vector<8x1xf32>
    tpu.vector_store %arg6[%c0_14, %c0_15], %24 {strides = array<i32>} : memref<8x1xf32, #tpu.memory_space<vmem>>, vector<8x1xf32>,
    return
  }
  func.func @transform_0(%arg0: i32) -> (i32, i32, i32) {
    %c0_i32 = arith.constant 0 : i32
    %c0_i32_0 = arith.constant 0 : i32
    %c0_i32_1 = arith.constant 0 : i32
    return %arg0, %c0_i32, %c0_i32_0 : i32, i32, i32
  }
  func.func @transform_1(%arg0: i32) -> (i32, i32) {
    %c0_i32 = arith.constant 0 : i32
    %c0_i32_0 = arith.constant 0 : i32
    %c0_i32_1 = arith.constant 0 : i32
    return %c0_i32, %c0_i32_0 : i32, i32
  }
  func.func @transform_2(%arg0: i32) -> (i32, i32) {
    %c0_i32 = arith.constant 0 : i32
    %c0_i32_0 = arith.constant 0 : i32
    %c0_i32_1 = arith.constant 0 : i32
    return %c0_i32, %c0_i32_0 : i32, i32
  }
  func.func @transform_3(%arg0: i32) -> (i32, i32) {
    %c0_i32 = arith.constant 0 : i32
    %c0_i32_0 = arith.constant 0 : i32
    return %arg0, %c0_i32 : i32, i32
  }
  func.func @transform_4(%arg0: i32) -> (i32, i32) {
    %c0_i32 = arith.constant 0 : i32
    %c0_i32_0 = arith.constant 0 : i32
    return %arg0, %c0_i32 : i32, i32
  }
  func.func @transform_5(%arg0: i32) -> (i32, i32) {
    %c0_i32 = arith.constant 0 : i32
    %c0_i32_0 = arith.constant 0 : i32
    return %arg0, %c0_i32 : i32, i32
  }
}

</mosaic_0001>

<bundles_post_ra>
// kernel: t5_multitask_forward.2
= control target key start
LH: loop header
LB: loop body
LE: loop exit
PB: predicated region body
PF: predicated region fallthrough
CT: control target
= control target key end

     0   :  { %s670_s20 = smov 0   ;;  %s727_s0 = inlined_call_operand.vmem [shape: bf16[15,16,64], index: 0, kind: input, shape index: {}]   ;;  %s728_s1 = inlined_call_operand.vmem [shape: f32[1,64], index: 1, kind: input, shape index: {}]   ;;  %s729_s2 = inlined_call_operand.<no memory space> [shape: f32[1,1], index: 2, kind: input, shape index: {}]   ;;  %s730_s3 = inlined_call_operand.vmem [shape: f32[15,1], index: 3, kind: input, shape index: {}]   ;;  %s731_s4 = inlined_call_operand.vmem [shape: f32[15,1], index: 4, kind: output, shape index: {0}]   ;;  %s732_s5 = inlined_call_operand.vmem [shape: f32[15,1], index: 5, kind: output, shape index: {1}]  }
   0x1   :  { %v11_v0 = vstv %s729_s2 }
   0x2   :  { %12 = vst [vmem:[#allocation2] sm:$0x1] %v11_v0 }
   0x3 LB: > { %s676_s21 = sadd.s32 4294967295, %s635_s20   ;;  %p566_p0 = scmp.ge.s32.totalorder %s635_s20, 1  ;;  %s635_s20 = sphi %s670_s20, %s18_s20  }
   0x4   : > { %p213_p1 = scmp.lt.s32.totalorder %s635_s20, 3 }
   0x6   : > { %p214_p2 = pnand %p566_p0, %p213_p1 }
   0x7   : > { %s567_s22 = sshll.u32 (!%p214_p2), %s676_s21, 3  ;;  %vm315_vm0 = vcmask (!%p214_p2), 523264   ;;  %vm413_vm1 = vcmask (!%p214_p2), 1041409   ;;  %vm416_vm2 = vcmask (!%p214_p2), 1042434   ;;  %vm419_vm3 = vcmask (!%p214_p2), 1043459   ;;  %p271_p4 = scmp.lt.s32.totalorder (!%p214_p2), %s676_s21, 1 }
   0x8   : > { %217 = sbr.rel (%p214_p2) target bundleno = 237 (0xed), region = 36  ;;  %p260_p3 = scmp.lt.s32.totalorder (!%p214_p2), %s567_s22, 14  ;;  %vm422_vm4 = vcmask (!%p214_p2), 1044484   ;;  %vm425_vm5 = vcmask (!%p214_p2), 1045509   ;;  %vm428_vm6 = vcmask (!%p214_p2), 1046534   ;;  %vm431_vm7 = vcmask (!%p214_p2), 1047559  }
   0x9   : > { %vm445_vm8 = vcmask (!%p214_p2), 7168  }
   0xf   : > { %s734_s22 = smov (!%p260_p3, %s567_s22), 14  ;;  %s736_s21 = smov (!%p271_p4, %s676_s21), 1 }
  0x10   : > { %s577_s2 = sshll.u32 %s734_s22, 3  ;;  %s708_s28 = sshll.u32 %s736_s21, 3 }
  0x11   : > { %s264_s25 = scalar_lea.vmem %s727_s0, %s577_s2  ;;  %s278_s6 = scalar_lea.vmem %s731_s4, %s708_s28 }
  0x12   : > { %v579_v1 = vld [vmem:[%s264_s25] sm:$0xff]   ;;  %v610_v2 = vld [vmem:[%s264_s25 + $0x8] sm:$0xff]   ;;  %v611_v3 = vld [vmem:[%s264_s25 + $0x10] sm:$0xff]   ;;  %s274_s9 = scalar_lea.vmem %s730_s3, %s708_s28  ;;  %s282_s12 = scalar_lea.vmem %s732_s5, %s708_s28 }
  0x13   : > { %v580_v4 = vunpack.c.l.bf16 %v579_v1  ;;  %v581_v5 = vunpack.c.h.bf16 %v579_v1  ;;  %v584_v6 = vunpack.c.l.bf16 %v610_v2  ;;  %v585_v7 = vunpack.c.h.bf16 %v610_v2  ;;  %v612_v8 = vld [vmem:[%s264_s25 + $0x18] sm:$0xff]   ;;  %v613_v9 = vld [vmem:[%s264_s25 + $0x20] sm:$0xff]   ;;  %v614_v10 = vld [vmem:[%s264_s25 + $0x28] sm:$0xff]  }
  0x14   : > { %v588_v11 = vunpack.c.l.bf16 %v611_v3  ;;  %v589_v12 = vunpack.c.h.bf16 %v611_v3  ;;  %v592_v13 = vunpack.c.l.bf16 %v612_v8  ;;  %v593_v14 = vunpack.c.h.bf16 %v612_v8  ;;  %v615_v15 = vld [vmem:[%s264_s25 + $0x30] sm:$0xff]   ;;  %v616_v16 = vld [vmem:[%s264_s25 + $0x38] sm:$0xff]  }
  0x15   : > { %v596_v17 = vunpack.c.l.bf16 %v613_v9  ;;  %v597_v18 = vunpack.c.h.bf16 %v613_v9  ;;  %v600_v19 = vunpack.c.l.bf16 %v614_v10  ;;  %v601_v20 = vunpack.c.h.bf16 %v614_v10 }
  0x16   : > { %v604_v21 = vunpack.c.l.bf16 %v615_v15  ;;  %v605_v22 = vunpack.c.h.bf16 %v615_v15  ;;  %v608_v23 = vunpack.c.l.bf16 %v616_v16  ;;  %v609_v24 = vunpack.c.h.bf16 %v616_v16 }
  0x17   : > { %v316_v25 = vsel %vm315_vm0, %v580_v4, 0.0  ;;  %v317_v26 = vsel %vm315_vm0, %v581_v5, 0.0  ;;  %v325_v27 = vsel %vm315_vm0, %v584_v6, 0.0  ;;  %v326_v28 = vsel %vm315_vm0, %v585_v7, 0.0 }
  0x18   : > { %v318_v29 = vadd.f32 %v317_v26, %v316_v25  ;;  %v327_v30 = vadd.f32 %v326_v28, %v325_v27  ;;  %v334_v31 = vsel %vm315_vm0, %v588_v11, 0.0  ;;  %v335_v32 = vsel %vm315_vm0, %v589_v12, 0.0 }
  0x19   : > { %v336_v33 = vadd.f32 %v335_v32, %v334_v31  ;;  %v343_v34 = vsel %vm315_vm0, %v592_v13, 0.0  ;;  %v344_v35 = vsel %vm315_vm0, %v593_v14, 0.0  ;;  %v352_v36 = vsel %vm315_vm0, %v596_v17, 0.0  ;;  %v573_v13 = vld [vmem:[%s728_s1] ss:$0 sm:$0xff] }
  0x1a   : > { %v319_v37 = vrot.slane %v318_v29, 4  ;;  %v328_v38 = vrot.slane %v327_v30, 4  ;;  %v345_v39 = vadd.f32 %v344_v35, %v343_v34  ;;  %v353_v40 = vsel %vm315_vm0, %v597_v18, 0.0 }
  0x1b   : > { %v337_v41 = vrot.slane %v336_v33, 4  ;;  %v354_v42 = vadd.f32 %v353_v40, %v352_v36  ;;  %v361_v43 = vsel %vm315_vm0, %v600_v19, 0.0  ;;  %v362_v44 = vsel %vm315_vm0, %v601_v20, 0.0 }
  0x1c   : > { %v320_v45 = vadd.f32 %v319_v37, %v318_v29  ;;  %v329_v46 = vadd.f32 %v328_v38, %v327_v30  ;;  %v346_v47 = vrot.slane %v345_v39, 4  ;;  %v363_v48 = vadd.f32 %v362_v44, %v361_v43 }
  0x1d   : > { %v338_v49 = vadd.f32 %v337_v41, %v336_v33  ;;  %v355_v50 = vrot.slane %v354_v42, 4  ;;  %v370_v51 = vsel %vm315_vm0, %v604_v21, 0.0  ;;  %v371_v52 = vsel %vm315_vm0, %v605_v22, 0.0 }
  0x1e   : > { %v321_v53 = vrot.slane %v320_v45, 2  ;;  %v330_v54 = vrot.slane %v329_v46, 2  ;;  %v347_v55 = vadd.f32 %v346_v47, %v345_v39  ;;  %v364_v56 = vrot.slane %v363_v48, 4 }
  0x1f   : > { %v339_v57 = vrot.slane %v338_v49, 2  ;;  %v356_v58 = vadd.f32 %v355_v50, %v354_v42  ;;  %v372_v59 = vadd.f32 %v371_v52, %v370_v51  ;;  %v379_v60 = vsel %vm315_vm0, %v608_v23, 0.0 }
  0x20   : > { %v322_v61 = vadd.f32 %v321_v53, %v320_v45  ;;  %v331_v62 = vadd.f32 %v330_v54, %v329_v46  ;;  %v348_v63 = vrot.slane %v347_v55, 2  ;;  %v365_v0 = vadd.f32 %v364_v56, %v363_v48 }
  0x21   : > { %v340_v1 = vadd.f32 %v339_v57, %v338_v49  ;;  %v357_v2 = vrot.slane %v356_v58, 2  ;;  %v373_v3 = vrot.slane %v372_v59, 4  ;;  %v380_v4 = vsel %vm315_vm0, %v609_v24, 0.0  ;;  %v574_v57 = vld [vmem:[#allocation2] ss:$0 sm:$0xff] }
  0x22   : > { %v323_v5 = vrot.slane %v322_v61, 1  ;;  %v332_v6 = vrot.slane %v331_v62, 1  ;;  %v349_v7 = vadd.f32 %v348_v63, %v347_v55  ;;  %v366_v8 = vrot.slane %v365_v0, 2 }
  0x23   : > { %v341_v9 = vrot.slane %v340_v1, 1  ;;  %v358_v10 = vadd.f32 %v357_v2, %v356_v58  ;;  %v374_v11 = vadd.f32 %v373_v3, %v372_v59  ;;  %v381_v12 = vadd.f32 %v380_v4, %v379_v60  ;;  %v447_v3 = vld [vmem:[%s274_s9] sm:$0xff] }
  0x24   : > { %v324_v14 = vadd.f32 %v323_v5, %v322_v61  ;;  %v333_v15 = vadd.f32 %v332_v6, %v331_v62  ;;  %v350_v16 = vrot.slane %v349_v7, 1  ;;  %v367_v17 = vadd.f32 %v366_v8, %v365_v0 }
  0x25   : > { %v342_v18 = vadd.f32 %v341_v9, %v340_v1  ;;  %v359_v19 = vrot.slane %v358_v10, 1  ;;  %v375_v20 = vrot.slane %v374_v11, 2  ;;  %v382_v21 = vrot.slane %v381_v12, 4 }
  0x26   : > { %v351_v22 = vadd.f32 %v350_v16, %v349_v7  ;;  %v368_v23 = vrot.slane %v367_v17, 1  ;;  %v396_v24 = vmul.f32 %v573_v13, %v324_v14  ;;  %v397_v25 = vmul.f32 %v573_v13, %v333_v15 }
  0x27   : > { %v360_v26 = vadd.f32 %v359_v19, %v358_v10  ;;  %v376_v27 = vadd.f32 %v375_v20, %v374_v11  ;;  %v383_v28 = vadd.f32 %v382_v21, %v381_v12  ;;  %v398_v29 = vmul.f32 %v573_v13, %v342_v18 }
  0x28   : > { %v369_v30 = vadd.f32 %v368_v23, %v367_v17  ;;  %v399_v31 = vmul.f32 %v573_v13, %v351_v22  ;;  %v412_v32 = vrot.slane %v397_v25, 7 }
  0x29   : > { %v377_v33 = vrot.slane %v376_v27, 1  ;;  %v384_v34 = vrot.slane %v383_v28, 2  ;;  %v400_v35 = vmul.f32 %v573_v13, %v360_v26  ;;  %v415_v36 = vrot.slane %v398_v29, 6 }
  0x2a   : > { %v401_v37 = vmul.f32 %v573_v13, %v369_v30  ;;  %v414_v38 = vsel %vm413_vm1, %v412_v32, %v396_v24  ;;  %v418_v39 = vrot.slane %v399_v31, 5 }
  0x2b   : > { %v378_v40 = vadd.f32 %v377_v33, %v376_v27  ;;  %v385_v41 = vadd.f32 %v384_v34, %v383_v28  ;;  %v417_v42 = vsel %vm416_vm2, %v415_v36, %v414_v38  ;;  %v421_v43 = vrot.slane %v400_v35, 4 }
  0x2c   : > { %v420_v44 = vsel %vm419_vm3, %v418_v39, %v417_v42  ;;  %v424_v45 = vrot.slane %v401_v37, 3 }
  0x2d   : > { %v386_v46 = vrot.slane %v385_v41, 1  ;;  %v402_v47 = vmul.f32 %v573_v13, %v378_v40  ;;  %v423_v48 = vsel %vm422_vm4, %v421_v43, %v420_v44 }
  0x2e   : > { %v426_v50 = vsel %vm425_vm5, %v424_v45, %v423_v48 }
  0x2f   : > { %v387_v49 = vadd.f32 %v386_v46, %v385_v41  ;;  %v427_v51 = vrot.slane %v402_v47, 2 }
  0x31   : > { %v403_v52 = vmul.f32 %v573_v13, %v387_v49  ;;  %v429_v53 = vsel %vm428_vm6, %v427_v51, %v426_v50 }
  0x33   : > { %v430_v54 = vrot.slane %v403_v52, 1 }
  0x35   : > { %v432_v55 = vsel %vm431_vm7, %v430_v54, %v429_v53 }
  0x36   : > { %v434_v56 = vsel %vm315_vm0, %v432_v55, 0.0 }
  0x37   : > { %435 = vadd.xlane.f32.xlu0 %v434_v56 }
  0xc4   : > { %v436_v58 = vpop.xlane.xlu0 %435 }
  0xc5   : > { %v437_v59 = vmul.f32 0.0625, %v436_v58 }
  0xc7   : > { %v444_v60 = vadd.f32 %v574_v57, %v437_v59 }
  0xc9   : > { %446 = vst.msk [vmem:[%s278_s6] sm:$0xff] %vm445_vm8, %v444_v60  ;;  %v451_v61 = vand.u32 2147483647, %v444_v60  ;;  %v448_v5 = vmax.f32 %v444_v60, 0.0  ;;  %v449_v6 = vmul.f32 %v447_v3, %v444_v60 }
  0xcb   : > { %v452_v62 = vsub.f32 0.0, %v451_v61  ;;  %v450_v11 = vsub.f32 %v448_v5, %v449_v6 }
  0xcd   : > { %v453_v63 = vmul.f32 1.442695, %v452_v62 }
  0xcf   : > { %625 = vpow2.f32 %v453_v63 }
  0xd9   : > { %v626_v0 = vpop.eup %625 }
  0xda   : > { %v455_v1 = vadd.f32 1.0, %v626_v0  ;;  %v458_v2 = vmul.f32 -0.5, %v626_v0  ;;  %v461_v7 = vand.u32 2147483647, %v626_v0 }
  0xdc   : > { %627 = vlog2.f32 %v455_v1  ;;  %v459_v4 = vadd.f32 1.0, %v458_v2  ;;  %vm462_vm9 = vcmp.lt.f32.partialorder %v461_v7, 0.0004427343 }
  0xde   : > { %v460_v10 = vmul.f32 %v626_v0, %v459_v4 }
  0xe6   : > { %v628_v8 = vpop.eup %627 }
  0xe7   : > { %v457_v9 = vmul.f32 0.6931472, %v628_v8 }
  0xe9   : > { %v463_v12 = vsel %vm462_vm9, %v460_v10, %v457_v9 }
  0xea   : > { %v464_v13 = vadd.f32 %v463_v12, %v450_v11 }
  0xec   : > { %465 = vst.msk [vmem:[%s282_s12] sm:$0xff] %vm445_vm8, %v464_v13 }
  0xed PF: > { %s18_s20 = sadd.s32 1, %s635_s20  }
  0xee   : > { %p15_p5 = scmp.ge.s32.totalorder %s18_s20, 4  }
  0xf0   :  { %17 = sbr.rel (!%p15_p5) target bundleno = 3 (0x3), region = 81 }

// kernel: t5_multitask_forward.3
= control target key start
LH: loop header
LB: loop body
LE: loop exit
PB: predicated region body
PF: predicated region fallthrough
CT: control target
= control target key end

     0   :  { %s535_s12 = smov 0   ;;  %s537_s13 = smov 0   ;;  %s619_s0 = inlined_call_operand.vmem [shape: s32[27,1], index: 0, kind: input, shape index: {}]   ;;  %s620_s1 = inlined_call_operand.vmem [shape: bf16[27,320], index: 1, kind: input, shape index: {}]   ;;  %s621_s2 = inlined_call_operand.vmem [shape: f32[27,1], index: 2, kind: output, shape index: {0}]   ;;  %s622_s3 = inlined_call_operand.vmem [shape: f32[27,1], index: 3, kind: output, shape index: {1}]  }
   0x1   :  { %s539_s14 = smov 0   ;;  %s541_s15 = smov 0  }
   0x2   :  { %s543_s16 = smov 0  }
   0x3 LB: > { %s23_s17 = sadd.s32 1, %s501_s14  ;;  %s26_s18 = sadd.s32 1, %s505_s15  ;;  %s509_s16 = sphi %s543_s16, %s14_s16   ;;  %s505_s15 = sphi %s541_s15, %s626_s15   ;;  %s501_s14 = sphi %s539_s14, %s625_s14   ;;  %s497_s13 = sphi %s537_s13, %s624_s13   ;;  %s493_s12 = sphi %s535_s12, %s623_s12  }
   0x4   : > { %p24_p0 = scmp.ge.s32.totalorder %s23_s17, 3  ;;  %p407_p1 = scmp.ge.s32.totalorder %s509_s16, 1 }
   0x5   : > { %p166_p2 = scmp.lt.s32.totalorder %s509_s16, 13 }
   0x6   : > { %s628_s17 = smov (%p24_p0, %s23_s17), 0  ;;  %s630_s18 = smov (!%p24_p0, %s26_s18), %s505_s15 }
   0x7   : > { %p167_p3 = pnand %p407_p1, %p166_p2  ;;  %p28_p4 = scmp.ge.s32.totalorder %s630_s18, 4 }
   0x8   : > { %p200_p5 = scmp.lt.s32.totalorder (!%p167_p3), %s497_s13, 3  ;;  %p206_p6 = scmp.lt.s32.totalorder (!%p167_p3), %s493_s12, 2 }
   0x9   : > { %s632_s18 = smov (%p28_p4, %s630_s18), 0  ;;  %170 = sbr.rel (%p167_p3) target bundleno = 488 (0x1e8), region = 28 }
   0xa   : > { %p412_p7 = scmp.ne.s32.totalorder (!%p167_p3), %s493_s12, 0 }
  0x10   : > { %s634_s13 = smov (!%p200_p5, %s497_s13), 3  ;;  %223 = sbr.rel (%p412_p7) target bundleno = 23 (0x17), region = 32 }
  0x11   : > { %s207_s19 = scalar_select %p206_p6, %s493_s12, 2 }
  0x12   : > { %s569_s20 = sshll.u32 %s634_s13, 3  ;;  %s418_s21 = smul.u32 3, %s634_s13  ;;  %vm224_vm0 = vcmask (!%p412_p7), 7168   ;;  %v511_v0 = vmov (!%p412_p7), -inf   ;;  %v512_v1 = vmov (!%p412_p7), 0.0  }
  0x13   : > { %s203_s24 = scalar_lea.vmem %s619_s0, %s569_s20  ;;  %s215_s27 = scalar_lea.vmem %s621_s2, %s569_s20  ;;  %225 = vst.msk [vmem:[#allocation2] sm:$0xff] (!%p412_p7), %vm224_vm0, %v511_v0  ;;  %226 = vst.msk [vmem:[#allocation3] sm:$0xff] (!%p412_p7), %vm224_vm0, %v512_v1 }
  0x14   : > { %s209_s28 = sadd.s32 %s418_s21, %s207_s19  ;;  %s219_s4 = scalar_lea.vmem %s622_s3, %s569_s20  ;;  %227 = vst.msk [vmem:[#allocation4] sm:$0xff] (!%p412_p7), %vm224_vm0, %v512_v1 }
  0x15   : > { %s409_s5 = sshll.u32 %s209_s28, 2 }
  0x16   : > { %s211_s8 = scalar_lea.vmem %s620_s1, %s409_s5 }
  0x17 PF: > { %v228_v2 = vld [vmem:[%s211_s8] sm:$0xf]  ;;  %v231_v3 = vlaneseq  ;;  %s413_s9 = sshll.u32 %s493_s12, 7  ;;  %v513_v8 = vmov 0   ;;  %vm258_vm2 = vcmask 7168   ;;  %p414_p8 = scmp.ne.s32.totalorder %s493_s12, 2 }
  0x18   : > { %v229_v4 = vunpack.c.l.bf16 %v228_v2  ;;  %s234_s10 = ssub.s32 320, %s413_s9  ;;  %463 = vset.pattern.permute.xlu0 %v513_v8  ;;  %464 = vset.pattern.permute.xlu1 %v513_v8  ;;  %v230_v9 = vld [vmem:[%s203_s24] sm:$0xff]  ;;  %v262_v10 = vstv %s413_s9  ;;  %v514_v32 = vmov (!%p414_p8), 0.0  }
  0x19   : > { %v232_v5 = vand.u32 127, %v231_v3  ;;  %v235_v6 = vstv %s234_s10  ;;  %v263_v11 = vsub.s32 %v230_v9, %v262_v10  ;;  %vm282_vm4 = vcmp.ne.s32.totalorder (!%p414_p8), %v230_v9, 4294967196 }
  0x1a   : > { %v238_v12 = vld [vmem:[#allocation2] sm:$0xff]  ;;  %v245_v24 = vld [vmem:[#allocation3] sm:$0xff]  ;;  %v415_v33 = vsel (!%p414_p8), %vm282_vm4, 1.0, %v514_v32 }
  0x1b   : > { %vm236_vm1 = vcmp.lt.s32.totalorder %v232_v5, %v235_v6  ;;  %265 = vperm.xlu1 %464, %v263_v11   ;;  %v261_v28 = vld [vmem:[#allocation4] sm:$0xff]  ;;  %289 = vst.msk [vmem:[%s219_s4] sm:$0xff] (!%p414_p8), %vm258_vm2, %v415_v33 }
  0x1c   : > { %v237_v7 = vsel %vm236_vm1, %v229_v4, -inf }
  0x1d   : > { %239 = vmax.xlane.f32.xlu0 %v237_v7 }
  0x9a   : > { %v266_v19 = vpop.permute.xlu1 %265 }
  0x9b   : > { %vm267_vm3 = vcmp.eq.s32.totalorder %v232_v5, %v266_v19 }
  0x9c   : > { %v268_v21 = vsel %vm267_vm3, %v237_v7, 0.0 }
  0xaa   : > { %v240_v13 = vpop.xlane.xlu0 %239 }
  0xab   : > { %v241_v14 = vmax.f32 %v238_v12, %v240_v13 }
  0xad   : > { %v242_v15 = vsub.f32 %v238_v12, %v241_v14  ;;  %260 = vst.msk [vmem:[#allocation2] sm:$0xff] %vm258_vm2, %v241_v14  ;;  %249 = vperm.xlu0 %463, %v241_v14  }
  0xaf   : > { %v243_v22 = vmul.f32 1.442695, %v242_v15 }
  0xb4   : > { %v277_v35 = vld [vmem:[#allocation2] sm:$0xff] (!%p414_p8) }
 0x12c   : > { %v250_v16 = vpop.permute.xlu0 %249 }
 0x12d   : > { %v252_v17 = vsub.f32 %v237_v7, %v250_v16 }
 0x12f   : > { %v253_v18 = vmul.f32 1.442695, %v252_v17 }
 0x131   : > { %465 = vpow2.f32 %v253_v18 }
 0x132   : > { %467 = vpow2.f32 %v243_v22 }
 0x13b   : > { %v466_v20 = vpop.eup %465 }
 0x13c   : > { %255 = vadd.xlane.f32.xlu1 %v466_v20  ;;  %v468_v23 = vpop.eup %467 }
 0x13d   : > { %v246_v25 = vmul.f32 %v468_v23, %v245_v24 }
 0x140   : > { %269 = vadd.xlane.f32.xlu1 %v268_v21 }
 0x1c9   : > { %v256_v26 = vpop.xlane.xlu1 %255 }
 0x1ca   : > { %v257_v27 = vadd.f32 %v256_v26, %v246_v25  ;;  %276 = sbr.rel (%p414_p8) target bundleno = 488 (0x1e8), region = 36 }
 0x1cc   : > { %259 = vst.msk [vmem:[#allocation3] sm:$0xff] %vm258_vm2, %v257_v27 }
 0x1cd   : > { %v270_v29 = vpop.xlane.xlu1 %269 }
 0x1ce   : > { %v271_v30 = vadd.f32 %v270_v29, %v261_v28 }
 0x1d0   : > { %272 = vst.msk [vmem:[#allocation4] sm:$0xff] %vm258_vm2, %v271_v30 }
 0x1d3   : > { %v278_v31 = vld [vmem:[#allocation3] sm:$0xff] }
 0x1d4   : > { %469 = vlog2.f32 %v278_v31 }
 0x1d7   : > { %v285_v37 = vld [vmem:[#allocation4] sm:$0xff] }
 0x1de   : > { %v470_v34 = vpop.eup %469 }
 0x1df   : > { %v280_v36 = vmul.f32 0.6931472, %v470_v34 }
 0x1e1   : > { %v281_v38 = vadd.f32 %v280_v36, %v277_v35 }
 0x1e3   : > { %v286_v39 = vsub.f32 %v281_v38, %v285_v37 }
 0x1e5   : > { %v287_v40 = vmul.f32 %v415_v33, %v286_v39 }
 0x1e7   : > { %288 = vst.msk [vmem:[%s215_s27] sm:$0xff] %vm258_vm2, %v287_v40 }
 0x1e8 PF: > { %s14_s16 = sadd.s32 1, %s509_s16   ;;  %s623_s12 = smov %s501_s14 }
 0x1e9   : > { %p11_p9 = scmp.ge.s32.totalorder %s14_s16, 14   ;;  %s624_s13 = smov %s505_s15 }
 0x1ea   : > { %s625_s14 = smov %s628_s17  ;;  %s626_s15 = smov %s632_s18 }
 0x1eb   :  { %13 = sbr.rel (!%p11_p9) target bundleno = 3 (0x3), region = 81 }

</bundles_post_ra>
